<compile_context>
chip_gen: v5e
topology: v5e:2x2
jax: 0.10.0
libtpu: 0.0.40
codegen_flags: <defaults>
</compile_context>

<pallas_src>
import jax
import jax.numpy as jnp
from jax import lax
from jax.experimental import pallas as pl
from jax.experimental.pallas import tpu as pltpu

IN_FEATURES = 768        # fixed by the module definition
HIDDEN = 32              # config.scorer_hidden_size (small synthetic value)
EPS = 1e-12              # torch.nn.functional.normalize default eps
_BIAS_PAD = 8            # bias rows sit on 8-row (sublane-tile) boundaries


def _scorer_kernel(x_ref, xa_ref, w1_ref, wb2_ref, o_ref):
    """Fused two-branch MLP + L2-normalized dot product for one batch tile."""
    tb = x_ref.shape[0]              # batch tile size
    h2 = w1_ref.shape[1]             # 2 * hidden
    h = h2 // 2

    # Bias rows of the packed W2+bias slab (slice starts 8-row aligned).
    b1 = wb2_ref[h2:h2 + 1, :]                               # [1, 2H]
    b2 = wb2_ref[h2 + _BIAS_PAD:h2 + _BIAS_PAD + 1, :]       # [1, 2H]

    # Layer 1 (K=768) on the MXU, f32 accumulation.  One dot per branch
    # against the resident packed W1; keep only this branch's half of the
    # result, so tanh is applied only to the half that is used and no
    # [2*tb, 768] concat copy is ever built.
    y1r = jnp.dot(x_ref[...], w1_ref[...], preferred_element_type=jnp.float32)
    y1a = jnp.dot(xa_ref[...], w1_ref[...], preferred_element_type=jnp.float32)
    h1r = jnp.tanh(y1r[:, :h] + b1[:, :h])                   # [tb, H] f32
    h1a = jnp.tanh(y1a[:, h:] + b1[:, h:])                   # [tb, H] f32

    # Layer 2: tiny f32 dots against the diagonal blocks of the slab.
    r = jnp.dot(h1r, wb2_ref[0:h, 0:h],
                preferred_element_type=jnp.float32) + b2[:, :h]   # [tb, H]
    a = jnp.dot(h1a, wb2_ref[h:h2, h:h2],
                preferred_element_type=jnp.float32) + b2[:, h:]   # [tb, H]

    # Fused F.normalize + dot:  <r,a> / (max(||r||,eps) * max(||a||,eps)),
    # using max(||v||,eps)^2 == max(||v||^2, eps^2).
    dot = jnp.sum(r * a, axis=-1, keepdims=True)                  # [tb, 1]
    sr = jnp.sum(r * r, axis=-1, keepdims=True)
    sa = jnp.sum(a * a, axis=-1, keepdims=True)
    score = (dot
             * lax.rsqrt(jnp.maximum(sr, EPS * EPS))
             * lax.rsqrt(jnp.maximum(sa, EPS * EPS)))             # [tb, 1]

    # Lane-dense store: per-row scalars laid along lanes of the (1, tb) block.
    o_ref[...] = jnp.transpose(score)                             # [1, tb]


def embedding_scorer(x, x_aug, w1_packed, wb2_packed, *, batch_tile=512):
    """x, x_aug: [B, 768] (f32 or bf16, already in the layer-1 matmul dtype).

    w1_packed : [768, 2H]     packed first-layer weights.
    wb2_packed: [2H+16, 2H]   f32 block-diag W2 + bias rows.
    Returns [B, 1] f32 scores.
    """
    B, in_f = x.shape
    tb = min(batch_tile, B)
    assert B % tb == 0, "batch must be a multiple of the batch tile"
    assert tb == B or tb % 128 == 0, (
        "batch tile must equal the batch or be a multiple of 128 "
        "(lane-dense output blocks)")
    grid = (B // tb,)
    out = pl.pallas_call(
        _scorer_kernel,
        out_shape=jax.ShapeDtypeStruct((1, B), jnp.float32),
        grid=grid,
        in_specs=[
            pl.BlockSpec((tb, in_f), lambda i: (i, 0)),
            pl.BlockSpec((tb, in_f), lambda i: (i, 0)),
            # Constant block index -> weights DMA'd once, VMEM-resident across
            # all grid steps.
            pl.BlockSpec(w1_packed.shape, lambda i: (0, 0)),
            pl.BlockSpec(wb2_packed.shape, lambda i: (0, 0)),
        ],
        out_specs=pl.BlockSpec((1, tb), lambda i: (0, i)),
        compiler_params=pltpu.CompilerParams(
            dimension_semantics=("parallel",)),
    )(x, x_aug, w1_packed, wb2_packed)
    return out.reshape(B, 1)


def init_params(key, in_features=IN_FEATURES, hidden=HIDDEN):
    """PyTorch-default-style init (uniform +-1/sqrt(fan_in)), weights [in, out]."""
    ks = jax.random.split(key, 8)

    def linear(kw, kb, fan_in, fan_out):
        bound = 1.0 / jnp.sqrt(fan_in)
        w = jax.random.uniform(kw, (fan_in, fan_out), jnp.float32, -bound, bound)
        b = jax.random.uniform(kb, (1, fan_out), jnp.float32, -bound, bound)
        return w, b

    w1r, b1r = linear(ks[0], ks[1], in_features, hidden)
    w2r, b2r = linear(ks[2], ks[3], hidden, hidden)
    w1a, b1a = linear(ks[4], ks[5], in_features, hidden)
    w2a, b2a = linear(ks[6], ks[7], hidden, hidden)
    return dict(w1_raw=w1r, b1_raw=b1r, w2_raw=w2r, b2_raw=b2r,
                w1_aug=w1a, b1_aug=b1a, w2_aug=w2a, b2_aug=b2a)


def pack_params(p, first_matmul_dtype=jnp.bfloat16):
    """Pack the 8 per-branch tensors into two fused slabs.

    Returns:
      w1_packed : [768, 2H]  first-layer weights, [w1_raw | w1_aug], cast to
                  `first_matmul_dtype` (bf16 = native MXU rate, half the DMA).
      wb2_packed: [2H+16, 2H] f32 slab:
                  rows 0:2H      -> block-diag(w2_raw, w2_aug)
                  row  2H        -> [b1_raw | b1_aug]
                  row  2H+8      -> [b2_raw | b2_aug]
                  (other rows zero padding for 8-row alignment)
    """
    h = p["w2_raw"].shape[0]
    w1 = jnp.concatenate([p["w1_raw"], p["w1_aug"]],
                         axis=1).astype(first_matmul_dtype)
    z = jnp.zeros((h, h), jnp.float32)
    w2 = jnp.block([[p["w2_raw"], z], [z, p["w2_aug"]]])          # [2H, 2H]
    b1 = jnp.concatenate([p["b1_raw"], p["b1_aug"]], axis=1)      # [1, 2H]
    b2 = jnp.concatenate([p["b2_raw"], p["b2_aug"]], axis=1)      # [1, 2H]
    pad = jnp.zeros((_BIAS_PAD - 1, 2 * h), jnp.float32)
    wb2 = jnp.concatenate([w2, b1, pad, b2, pad], axis=0)         # [2H+16, 2H]
    return w1, wb2


def reference(x, x_aug, p):
    """Pure-JAX f32 reference matching the PyTorch module."""
    def proj(v, w1, b1, w2, b2):
        return jnp.tanh(v @ w1 + b1) @ w2 + b2

    def nrm(v):
        return v / jnp.maximum(jnp.linalg.norm(v, axis=-1, keepdims=True), EPS)

    r = proj(x, p["w1_raw"], p["b1_raw"], p["w2_raw"], p["b2_raw"])
    a = proj(x_aug, p["w1_aug"], p["b1_aug"], p["w2_aug"], p["b2_aug"])
    return jnp.sum(nrm(r) * nrm(a), axis=-1, keepdims=True)


if __name__ == "__main__":
    key = jax.random.PRNGKey(0)
    kx, kxa, kx2, kxa2, kp = jax.random.split(key, 5)
    params = init_params(kp)

    # --- Exact-semantics f32 path at a tiny batch (single full-block tile).
    B0 = 16
    x = jax.random.normal(kx, (B0, IN_FEATURES), jnp.float32)
    x_aug = jax.random.normal(kxa, (B0, IN_FEATURES), jnp.float32)
    ref = reference(x, x_aug, params)
    w1_f32, wb2_f32 = pack_params(params, first_matmul_dtype=jnp.float32)
    out_f32 = jax.block_until_ready(
        embedding_scorer(x, x_aug, w1_f32, wb2_f32, batch_tile=B0))
    assert out_f32.shape == (B0, 1), out_f32.shape
    assert jnp.allclose(out_f32, ref, atol=1e-4, rtol=1e-4), (out_f32, ref)

    # --- bf16-activation fast path, multi-step grid (2 lane-aligned tiles ->
    #     both TensorCores on v7x, VMEM-resident weights across steps).
    B1 = 256
    xb = jax.random.normal(kx2, (B1, IN_FEATURES), jnp.float32)
    xab = jax.random.normal(kxa2, (B1, IN_FEATURES), jnp.float32)
    ref_b = reference(xb, xab, params)
    w1_bf16, wb2 = pack_params(params, first_matmul_dtype=jnp.bfloat16)
    out_bf16 = jax.block_until_ready(
        embedding_scorer(xb.astype(jnp.bfloat16), xab.astype(jnp.bfloat16),
                         w1_bf16, wb2, batch_tile=128))
    assert out_bf16.shape == (B1, 1), out_bf16.shape
    # bf16 activations + weights round the K=768 contraction; tolerance loosened.
    assert jnp.allclose(out_bf16, ref_b, atol=3e-2, rtol=0.0), (
        float(jnp.max(jnp.abs(out_bf16 - ref_b))))

    print("KERNEL_OK")
</pallas_src>

<mosaic_0001>
module attributes {stable_mosaic.version = 11 : i64} {
  func.func @_scorer_kernel(%arg0: i32, %arg1: memref<16x768xf32, #tpu.memory_space<vmem>>, %arg2: memref<16x768xf32, #tpu.memory_space<vmem>>, %arg3: memref<768x64xf32, #tpu.memory_space<vmem>>, %arg4: memref<80x64xf32, #tpu.memory_space<vmem>>, %arg5: memref<1x16xf32, #tpu.memory_space<vmem>>) attributes {dimension_semantics = [#tpu.dimension_semantics<parallel>], iteration_bounds = array<i64: 1>, scalar_prefetch = 0 : i64, scratch_operands = 0 : i64, tpu.core_type = #tpu.core_type<tc>, window_params = [{transform_indices = @transform_0, window_bounds = array<i64: 16, 768>}, {transform_indices = @transform_1, window_bounds = array<i64: 16, 768>}, {pipeline_mode = #tpu.pipeline_mode<synchronous>, transform_indices = @transform_2, window_bounds = array<i64: 768, 64>}, {pipeline_mode = #tpu.pipeline_mode<synchronous>, transform_indices = @transform_3, window_bounds = array<i64: 80, 64>}, {transform_indices = @transform_4, window_bounds = array<i64: 1, 16>}]} {
    %c64 = arith.constant 64 : index
    %c0 = arith.constant 0 : index
    %0 = vector.load %arg4[%c64, %c0] : memref<80x64xf32, #tpu.memory_space<vmem>>, vector<1x64xf32>
    %c72 = arith.constant 72 : index
    %c0_0 = arith.constant 0 : index
    %1 = vector.load %arg4[%c72, %c0_0] : memref<80x64xf32, #tpu.memory_space<vmem>>, vector<1x64xf32>
    %c0_1 = arith.constant 0 : index
    %c0_2 = arith.constant 0 : index
    %2 = vector.load %arg1[%c0_1, %c0_2] : memref<16x768xf32, #tpu.memory_space<vmem>>, vector<16x768xf32>
    %c0_3 = arith.constant 0 : index
    %c0_4 = arith.constant 0 : index
    %3 = vector.load %arg3[%c0_3, %c0_4] : memref<768x64xf32, #tpu.memory_space<vmem>>, vector<768x64xf32>
    %cst = arith.constant dense<0.000000e+00> : vector<16x64xf32>
    %4 = tpu.matmul %2, %3, %cst {dimension_numbers = #tpu.dot_dimension_numbers<[1], [0], [0], [1], [0, 0, 1, 1], [], []>} : vector<16x768xf32>, vector<768x64xf32>, vector<16x64xf32> -> vector<16x64xf32>
    %c0_5 = arith.constant 0 : index
    %c0_6 = arith.constant 0 : index
    %5 = vector.load %arg2[%c0_5, %c0_6] : memref<16x768xf32, #tpu.memory_space<vmem>>, vector<16x768xf32>
    %c0_7 = arith.constant 0 : index
    %c0_8 = arith.constant 0 : index
    %6 = vector.load %arg3[%c0_7, %c0_8] : memref<768x64xf32, #tpu.memory_space<vmem>>, vector<768x64xf32>
    %cst_9 = arith.constant dense<0.000000e+00> : vector<16x64xf32>
    %7 = tpu.matmul %5, %6, %cst_9 {dimension_numbers = #tpu.dot_dimension_numbers<[1], [0], [0], [1], [0, 0, 1, 1], [], []>} : vector<16x768xf32>, vector<768x64xf32>, vector<16x64xf32> -> vector<16x64xf32>
    %8 = vector.extract_strided_slice %4 {offsets = [0, 0], sizes = [16, 32], strides = [1, 1]} : vector<16x64xf32> to vector<16x32xf32>
    %9 = vector.extract_strided_slice %0 {offsets = [0, 0], sizes = [1, 32], strides = [1, 1]} : vector<1x64xf32> to vector<1x32xf32>
    %10 = vector.broadcast %9 : vector<1x32xf32> to vector<16x32xf32>
    %11 = arith.addf %8, %10 : vector<16x32xf32>
    %12 = math.tanh %11 : vector<16x32xf32>
    %13 = vector.extract_strided_slice %7 {offsets = [0, 32], sizes = [16, 32], strides = [1, 1]} : vector<16x64xf32> to vector<16x32xf32>
    %14 = vector.extract_strided_slice %0 {offsets = [0, 32], sizes = [1, 32], strides = [1, 1]} : vector<1x64xf32> to vector<1x32xf32>
    %15 = vector.broadcast %14 : vector<1x32xf32> to vector<16x32xf32>
    %16 = arith.addf %13, %15 : vector<16x32xf32>
    %17 = math.tanh %16 : vector<16x32xf32>
    %c0_10 = arith.constant 0 : index
    %c0_11 = arith.constant 0 : index
    %18 = vector.load %arg4[%c0_10, %c0_11] : memref<80x64xf32, #tpu.memory_space<vmem>>, vector<32x32xf32>
    %cst_12 = arith.constant dense<0.000000e+00> : vector<16x32xf32>
    %19 = tpu.matmul %12, %18, %cst_12 {dimension_numbers = #tpu.dot_dimension_numbers<[1], [0], [0], [1], [0, 0, 1, 1], [], []>} : vector<16x32xf32>, vector<32x32xf32>, vector<16x32xf32> -> vector<16x32xf32>
    %20 = vector.extract_strided_slice %1 {offsets = [0, 0], sizes = [1, 32], strides = [1, 1]} : vector<1x64xf32> to vector<1x32xf32>
    %21 = vector.broadcast %20 : vector<1x32xf32> to vector<16x32xf32>
    %22 = arith.addf %19, %21 : vector<16x32xf32>
    %c32 = arith.constant 32 : index
    %c32_13 = arith.constant 32 : index
    %23 = vector.load %arg4[%c32, %c32_13] : memref<80x64xf32, #tpu.memory_space<vmem>>, vector<32x32xf32>
    %cst_14 = arith.constant dense<0.000000e+00> : vector<16x32xf32>
    %24 = tpu.matmul %17, %23, %cst_14 {dimension_numbers = #tpu.dot_dimension_numbers<[1], [0], [0], [1], [0, 0, 1, 1], [], []>} : vector<16x32xf32>, vector<32x32xf32>, vector<16x32xf32> -> vector<16x32xf32>
    %25 = vector.extract_strided_slice %1 {offsets = [0, 32], sizes = [1, 32], strides = [1, 1]} : vector<1x64xf32> to vector<1x32xf32>
    %26 = vector.broadcast %25 : vector<1x32xf32> to vector<16x32xf32>
    %27 = arith.addf %24, %26 : vector<16x32xf32>
    %28 = arith.mulf %22, %27 : vector<16x32xf32>
    %cst_15 = arith.constant dense<0.000000e+00> : vector<16xf32>
    %29 = vector.multi_reduction <add>, %28, %cst_15 [1] : vector<16x32xf32> to vector<16xf32>
    %30 = vector.shape_cast %29 : vector<16xf32> to vector<16x1xf32>
    %31 = arith.mulf %22, %22 : vector<16x32xf32>
    %cst_16 = arith.constant dense<0.000000e+00> : vector<16xf32>
    %32 = vector.multi_reduction <add>, %31, %cst_16 [1] : vector<16x32xf32> to vector<16xf32>
    %33 = vector.shape_cast %32 : vector<16xf32> to vector<16x1xf32>
    %34 = arith.mulf %27, %27 : vector<16x32xf32>
    %cst_17 = arith.constant dense<0.000000e+00> : vector<16xf32>
    %35 = vector.multi_reduction <add>, %34, %cst_17 [1] : vector<16x32xf32> to vector<16xf32>
    %36 = vector.shape_cast %35 : vector<16xf32> to vector<16x1xf32>
    %cst_18 = arith.constant 1.000000e-24 : f32
    %37 = vector.broadcast %cst_18 : f32 to vector<16x1xf32>
    %38 = arith.maximumf %33, %37 : vector<16x1xf32>
    %39 = math.rsqrt %38 : vector<16x1xf32>
    %40 = arith.mulf %30, %39 : vector<16x1xf32>
    %cst_19 = arith.constant 1.000000e-24 : f32
    %41 = vector.broadcast %cst_19 : f32 to vector<16x1xf32>
    %42 = arith.maximumf %36, %41 : vector<16x1xf32>
    %43 = math.rsqrt %42 : vector<16x1xf32>
    %44 = arith.mulf %40, %43 : vector<16x1xf32>
    %45 = tpu.transpose %44, [1, 0] : vector<16x1xf32> -> vector<1x16xf32>
    %c0_20 = arith.constant 0 : index
    %c0_21 = arith.constant 0 : index
    %46 = vector.load %arg5[%c0_20, %c0_21] : memref<1x16xf32, #tpu.memory_space<vmem>>, vector<1x16xf32>
    tpu.vector_store %arg5[%c0_20, %c0_21], %45 {strides = array<i32>} : memref<1x16xf32, #tpu.memory_space<vmem>>, vector<1x16xf32>,
    return
  }
  func.func @transform_0(%arg0: i32) -> (i32, i32) {
    %c0_i32 = arith.constant 0 : i32
    %c0_i32_0 = arith.constant 0 : i32
    return %arg0, %c0_i32 : i32, i32
  }
  func.func @transform_1(%arg0: i32) -> (i32, i32) {
    %c0_i32 = arith.constant 0 : i32
    %c0_i32_0 = arith.constant 0 : i32
    return %arg0, %c0_i32 : i32, i32
  }
  func.func @transform_2(%arg0: i32) -> (i32, i32) {
    %c0_i32 = arith.constant 0 : i32
    %c0_i32_0 = arith.constant 0 : i32
    %c0_i32_1 = arith.constant 0 : i32
    return %c0_i32, %c0_i32_0 : i32, i32
  }
  func.func @transform_3(%arg0: i32) -> (i32, i32) {
    %c0_i32 = arith.constant 0 : i32
    %c0_i32_0 = arith.constant 0 : i32
    %c0_i32_1 = arith.constant 0 : i32
    return %c0_i32, %c0_i32_0 : i32, i32
  }
  func.func @transform_4(%arg0: i32) -> (i32, i32) {
    %c0_i32 = arith.constant 0 : i32
    %c0_i32_0 = arith.constant 0 : i32
    return %c0_i32, %arg0 : i32, i32
  }
}

</mosaic_0001>

<bundles_post_ra>
// kernel: tpu_custom_call.1
= control target key start
LH: loop header
LB: loop body
LE: loop exit
PB: predicated region body
PF: predicated region fallthrough
CT: control target
= control target key end

     0   :  { %s1527_s0 = inlined_call_operand.vmem [shape: f32[16,768], index: 0, kind: input, shape index: {}]   ;;  %s1528_s1 = inlined_call_operand.vmem [shape: f32[16,768], index: 1, kind: input, shape index: {}]   ;;  %s1529_s2 = inlined_call_operand.vmem [shape: f32[768,64], index: 2, kind: input, shape index: {}]   ;;  %s1530_s3 = inlined_call_operand.vmem [shape: f32[80,64], index: 3, kind: input, shape index: {}]   ;;  %s1531_s4 = inlined_call_operand.hbm [shape: f32[1,16], index: 4, kind: output, shape index: {}]  }
   0x1   :  { %v738_v0 = vld [vmem:[%s1529_s2 + $0x78] sm:$0xff]  ;;  %v748_v2 = vld [vmem:[%s1529_s2 + $0x70] sm:$0xff]  ;;  %v772_v6 = vld [vmem:[%s1529_s2 + $0x68] sm:$0xff] }
   0x2   :  { %v743_v1 = vld [vmem:[%s1529_s2 + $0x178] sm:$0xff]  ;;  %128 = vmatpush.msra.mxu0 %v738_v0  ;;  %v760_v4 = vld [vmem:[%s1529_s2 + $0x170] sm:$0xff]  ;;  %v782_v8 = vld [vmem:[%s1529_s2 + $0x168] sm:$0xff] }
   0x3   :  { %174 = vmatpush.msra.mxu2 %v743_v1  ;;  %v755_v3 = vld [vmem:[%s1529_s2 + $0xf8] sm:$0xff]  ;;  %v777_v7 = vld [vmem:[%s1529_s2 + $0xf0] sm:$0xff]  ;;  %v794_v10 = vld [vmem:[%s1529_s2 + $0xe8] sm:$0xff] }
   0x4   :  { %v765_v5 = vld [vmem:[%s1529_s2 + $0x1f8] sm:$0xff]  ;;  %151 = vmatpush.msra.mxu1 %v755_v3  ;;  %129 = vmatpush.msra.mxu0 %v748_v2  ;;  %v789_v9 = vld [vmem:[%s1529_s2 + $0x1f0] sm:$0xff]  ;;  %v801_v11 = vld [vmem:[%s1529_s2 + $0x60] sm:$0xff] }
   0x5   :  { %197 = vmatpush.msra.mxu3 %v765_v5  ;;  %175 = vmatpush.msra.mxu2 %v760_v4  ;;  %v806_v12 = vld [vmem:[%s1529_s2 + $0x160] sm:$0xff]  ;;  %v811_v13 = vld [vmem:[%s1529_s2 + $0x1e8] sm:$0xff]  ;;  %v830_v16 = vld [vmem:[%s1529_s2 + $0x58] sm:$0xff] }
   0x6   :  { %152 = vmatpush.msra.mxu1 %v777_v7  ;;  %130 = vmatpush.msra.mxu0 %v772_v6  ;;  %v818_v14 = vld [vmem:[%s1529_s2 + $0xe0] sm:$0xff]  ;;  %v835_v17 = vld [vmem:[%s1529_s2 + $0x158] sm:$0xff]  ;;  %v854_v20 = vld [vmem:[%s1529_s2 + $0x50] sm:$0xff] }
   0x7   :  { %198 = vmatpush.msra.mxu3 %v789_v9  ;;  %176 = vmatpush.msra.mxu2 %v782_v8  ;;  %v823_v15 = vld [vmem:[%s1529_s2 + $0x1e0] sm:$0xff]  ;;  %v842_v18 = vld [vmem:[%s1529_s2 + $0xd8] sm:$0xff]  ;;  %v859_v21 = vld [vmem:[%s1529_s2 + $0x150] sm:$0xff] }
   0x8   :  { %153 = vmatpush.msra.mxu1 %v794_v10  ;;  %131 = vmatpush.msra.mxu0 %v801_v11  ;;  %v847_v19 = vld [vmem:[%s1529_s2 + $0x1d8] sm:$0xff]  ;;  %v866_v22 = vld [vmem:[%s1529_s2 + $0xd0] sm:$0xff]  ;;  %v878_v24 = vld [vmem:[%s1529_s2 + $0x48] sm:$0xff] }
   0x9   :  { %199 = vmatpush.msra.mxu3 %v811_v13  ;;  %177 = vmatpush.msra.mxu2 %v806_v12  ;;  %v871_v23 = vld [vmem:[%s1529_s2 + $0x1d0] sm:$0xff]  ;;  %v883_v25 = vld [vmem:[%s1529_s2 + $0x148] sm:$0xff]  ;;  %v902_v28 = vld [vmem:[%s1529_s2 + $0x40] sm:$0xff] }
   0xa   :  { %154 = vmatpush.msra.mxu1 %v818_v14  ;;  %132 = vmatpush.msra.mxu0 %v830_v16  ;;  %v890_v26 = vld [vmem:[%s1529_s2 + $0xc8] sm:$0xff]  ;;  %v907_v29 = vld [vmem:[%s1529_s2 + $0x140] sm:$0xff]  ;;  %v926_v32 = vld [vmem:[%s1529_s2 + $0x38] sm:$0xff] }
   0xb   :  { %200 = vmatpush.msra.mxu3 %v823_v15  ;;  %178 = vmatpush.msra.mxu2 %v835_v17  ;;  %v895_v27 = vld [vmem:[%s1529_s2 + $0x1c8] sm:$0xff]  ;;  %v914_v30 = vld [vmem:[%s1529_s2 + $0xc0] sm:$0xff]  ;;  %v931_v33 = vld [vmem:[%s1529_s2 + $0x138] sm:$0xff] }
   0xc   :  { %155 = vmatpush.msra.mxu1 %v842_v18  ;;  %133 = vmatpush.msra.mxu0 %v854_v20  ;;  %v919_v31 = vld [vmem:[%s1529_s2 + $0x1c0] sm:$0xff]  ;;  %v938_v34 = vld [vmem:[%s1529_s2 + $0xb8] sm:$0xff]  ;;  %v950_v36 = vld [vmem:[%s1529_s2 + $0x30] sm:$0xff] }
   0xd   :  { %201 = vmatpush.msra.mxu3 %v847_v19  ;;  %179 = vmatpush.msra.mxu2 %v859_v21  ;;  %v943_v35 = vld [vmem:[%s1529_s2 + $0x1b8] sm:$0xff]  ;;  %v955_v37 = vld [vmem:[%s1529_s2 + $0x130] sm:$0xff]  ;;  %v974_v40 = vld [vmem:[%s1529_s2 + $0x28] sm:$0xff] }
   0xe   :  { %156 = vmatpush.msra.mxu1 %v866_v22  ;;  %134 = vmatpush.msra.mxu0 %v878_v24  ;;  %v962_v38 = vld [vmem:[%s1529_s2 + $0xb0] sm:$0xff]  ;;  %v979_v41 = vld [vmem:[%s1529_s2 + $0x128] sm:$0xff]  ;;  %v998_v44 = vld [vmem:[%s1529_s2 + $0x20] sm:$0xff] }
   0xf   :  { %202 = vmatpush.msra.mxu3 %v871_v23  ;;  %180 = vmatpush.msra.mxu2 %v883_v25  ;;  %v967_v39 = vld [vmem:[%s1529_s2 + $0x1b0] sm:$0xff]  ;;  %v986_v42 = vld [vmem:[%s1529_s2 + $0xa8] sm:$0xff]  ;;  %v1003_v45 = vld [vmem:[%s1529_s2 + $0x120] sm:$0xff] }
  0x10   :  { %157 = vmatpush.msra.mxu1 %v890_v26  ;;  %135 = vmatpush.msra.mxu0 %v902_v28  ;;  %v991_v43 = vld [vmem:[%s1529_s2 + $0x1a8] sm:$0xff]  ;;  %v1010_v46 = vld [vmem:[%s1529_s2 + $0xa0] sm:$0xff]  ;;  %v1022_v48 = vld [vmem:[%s1529_s2 + $0x18] sm:$0xff] }
  0x11   :  { %203 = vmatpush.msra.mxu3 %v895_v27  ;;  %181 = vmatpush.msra.mxu2 %v907_v29  ;;  %v1015_v47 = vld [vmem:[%s1529_s2 + $0x1a0] sm:$0xff]  ;;  %v1027_v49 = vld [vmem:[%s1529_s2 + $0x118] sm:$0xff]  ;;  %v1046_v52 = vld [vmem:[%s1529_s2 + $0x10] sm:$0xff] }
  0x12   :  { %158 = vmatpush.msra.mxu1 %v914_v30  ;;  %136 = vmatpush.msra.mxu0 %v926_v32  ;;  %1540 = vst [vmem:[#allocation5_spill] sm:$0xff] %v1015_v47  ;;  %v1034_v50 = vld [vmem:[%s1529_s2 + $0x98] sm:$0xff]  ;;  %v1051_v53 = vld [vmem:[%s1529_s2 + $0x110] sm:$0xff]  ;;  %v1070_v56 = vld [vmem:[%s1529_s2 + $0x8] sm:$0xff] }
  0x13   :  { %204 = vmatpush.msra.mxu3 %v919_v31  ;;  %182 = vmatpush.msra.mxu2 %v931_v33  ;;  %v1039_v51 = vld [vmem:[%s1529_s2 + $0x198] sm:$0xff]  ;;  %1542 = vst [vmem:[#allocation7_spill] sm:$0xff] %v1051_v53  ;;  %v1058_v54 = vld [vmem:[%s1529_s2 + $0x90] sm:$0xff]  ;;  %v1075_v57 = vld [vmem:[%s1529_s2 + $0x108] sm:$0xff] }
  0x14   :  { %159 = vmatpush.msra.mxu1 %v938_v34  ;;  %137 = vmatpush.msra.mxu0 %v950_v36  ;;  %1541 = vst [vmem:[#allocation6_spill] sm:$0xff] %v1039_v51  ;;  %v1063_v55 = vld [vmem:[%s1529_s2 + $0x190] sm:$0xff]  ;;  %v1082_v58 = vld [vmem:[%s1529_s2 + $0x88] sm:$0xff]  ;;  %v1094_v60 = vld [vmem:[%s1529_s2] sm:$0xff] }
  0x15   :  { %205 = vmatpush.msra.mxu3 %v943_v35  ;;  %183 = vmatpush.msra.mxu2 %v955_v37  ;;  %1543 = vst [vmem:[#allocation8_spill] sm:$0xff] %v1063_v55  ;;  %v1087_v59 = vld [vmem:[%s1529_s2 + $0x188] sm:$0xff]  ;;  %v1099_v61 = vld [vmem:[%s1529_s2 + $0x100] sm:$0xff]  ;;  %v1106_v62 = vld [vmem:[%s1529_s2 + $0x278] sm:$0xff] }
  0x16   :  { %160 = vmatpush.msra.mxu1 %v962_v38  ;;  %138 = vmatpush.msra.mxu0 %v974_v40  ;;  %1544 = vst [vmem:[#allocation9_spill] sm:$0xff] %v1075_v57  ;;  %v1113_v63 = vld [vmem:[%s1529_s2 + $0x80] sm:$0xff] }
  0x17   :  { %206 = vmatpush.msra.mxu3 %v967_v39  ;;  %184 = vmatpush.msra.mxu2 %v979_v41  ;;  %1545 = vst [vmem:[#allocation10_spill] sm:$0xff] %v1087_v59 }
  0x18   :  { %161 = vmatpush.msra.mxu1 %v986_v42  ;;  %139 = vmatpush.msra.mxu0 %v998_v44  ;;  %1546 = vst [vmem:[#allocation11_spill] sm:$0xff] %v1099_v61 }
  0x19   :  { %207 = vmatpush.msra.mxu3 %v991_v43  ;;  %185 = vmatpush.msra.mxu2 %v1003_v45 }
  0x1a   :  { %162 = vmatpush.msra.mxu1 %v1010_v46  ;;  %140 = vmatpush.msra.mxu0 %v1022_v48 }
  0x1b   :  { %208 = vmatpush.msra.mxu3 %v1015_v47  ;;  %186 = vmatpush.msra.mxu2 %v1027_v49 }
  0x1c   :  { %163 = vmatpush.msra.mxu1 %v1034_v50  ;;  %141 = vmatpush.msra.mxu0 %v1046_v52 }
  0x1d   :  { %209 = vmatpush.msra.mxu3 %v1039_v51  ;;  %187 = vmatpush.msra.mxu2 %v1051_v53  ;;  %v1144_v51 = vld [vmem:[%s1529_s2 + $0x2f0] sm:$0xff] }
  0x1e   :  { %164 = vmatpush.msra.mxu1 %v1058_v54  ;;  %142 = vmatpush.msra.mxu0 %v1070_v56 }
  0x1f   :  { %210 = vmatpush.msra.mxu3 %v1063_v55  ;;  %188 = vmatpush.msra.mxu2 %v1075_v57  ;;  %v1118_v55 = vld [vmem:[%s1529_s2 + $0x180] sm:$0xff]  ;;  %v1125_v57 = vld [vmem:[%s1529_s2 + $0x270] sm:$0xff] }
  0x20   :  { %165 = vmatpush.msra.mxu1 %v1082_v58  ;;  %1547 = vst [vmem:[#allocation12_spill] sm:$0xff] %v1118_v55  ;;  %143 = vmatpush.msra.mxu0 %v1094_v60 }
  0x21   :  { %211 = vmatpush.msra.mxu3 %v1087_v59  ;;  %189 = vmatpush.msra.mxu2 %v1099_v61  ;;  %v1130_v59 = vld [vmem:[%s1529_s2 + $0x2f8] sm:$0xff]  ;;  %v1139_v61 = vld [vmem:[%s1529_s2 + $0x268] sm:$0xff] }
  0x22   :  { %220 = vmatpush.msrb.mxu0 %v1106_v62  ;;  %166 = vmatpush.msra.mxu1 %v1113_v63 }
  0x23   :  { %278 = vmatpush.msrb.mxu2 %v738_v0  ;;  %212 = vmatpush.msra.mxu3 %v1118_v55 }
  0x24   :  { %221 = vmatpush.msrb.mxu0 %v1125_v57  ;;  %243 = vmatpush.msrb.mxu1 %v1130_v59 }
  0x25   :  { %9 = vsyncpa [#allocation3], 0  ;;  %279 = vmatpush.msrb.mxu2 %v748_v2  ;;  %301 = vmatpush.msrb.mxu3 %v755_v3  ;;  %v1153_v0 = vld [vmem:[%s1529_s2 + $0x260] sm:$0xff]  ;;  %v1158_v55 = vld [vmem:[%s1529_s2 + $0x2e8] sm:$0xff]  ;;  %vm430_vm0 = vcmask 261120   ;;  %s708_s30 = smov 96  }
  0x26   :  { %222 = vmatpush.msrb.mxu0 %v1139_v61  ;;  %244 = vmatpush.msrb.mxu1 %v1144_v51  ;;  %v1167_v2 = vld [vmem:[%s1529_s2 + $0x258] sm:$0xff]  ;;  %v1172_v3 = vld [vmem:[%s1529_s2 + $0x2e0] sm:$0xff]  ;;  %s630_s14 = sshll.u32 %s1531_s4, 4  ;;  %vm621_vm13 = vcmask 122880   ;;  %s631_s14 = int_to_ptr.hbm [resolvable:$true] %s630_s14 }
  0x27   :  { %280 = vmatpush.msrb.mxu2 %v772_v6  ;;  %302 = vmatpush.msrb.mxu3 %v777_v7  ;;  %v1181_v6 = vld [vmem:[%s1529_s2 + $0x250] sm:$0xff]  ;;  %v1186_v7 = vld [vmem:[%s1529_s2 + $0x2d8] sm:$0xff] }
  0x28   :  { %223 = vmatpush.msrb.mxu0 %v1153_v0  ;;  %245 = vmatpush.msrb.mxu1 %v1158_v55  ;;  %v1233_v53 = vld [vmem:[%s1529_s2 + $0x238] sm:$0xff] }
  0x29   :  { %281 = vmatpush.msrb.mxu2 %v801_v11  ;;  %303 = vmatpush.msrb.mxu3 %v794_v10  ;;  %v1195_v10 = vld [vmem:[%s1529_s2 + $0x248] sm:$0xff]  ;;  %v1200_v11 = vld [vmem:[%s1529_s2 + $0x2d0] sm:$0xff]  ;;  %v1249_v47 = vld [vmem:[%s1529_s2 + $0x2b8] sm:$0xff] }
  0x2a   :  { %224 = vmatpush.msrb.mxu0 %v1167_v2  ;;  %246 = vmatpush.msrb.mxu1 %v1172_v3 }
  0x2b   :  { %282 = vmatpush.msrb.mxu2 %v830_v16  ;;  %304 = vmatpush.msrb.mxu3 %v818_v14  ;;  %v1209_v14 = vld [vmem:[%s1529_s2 + $0x240] sm:$0xff]  ;;  %v1214_v16 = vld [vmem:[%s1529_s2 + $0x2c8] sm:$0xff] }
  0x2c   :  { %225 = vmatpush.msrb.mxu0 %v1181_v6  ;;  %247 = vmatpush.msrb.mxu1 %v1186_v7 }
  0x2d   :  { %283 = vmatpush.msrb.mxu2 %v854_v20  ;;  %305 = vmatpush.msrb.mxu3 %v842_v18  ;;  %v20_v18 = vld [vmem:[%s1527_s0] sm:$0xff] }
  0x2e   :  { %226 = vmatpush.msrb.mxu0 %v1195_v10  ;;  %248 = vmatpush.msrb.mxu1 %v1200_v11  ;;  %v1226_v20 = vld [vmem:[%s1529_s2 + $0x2c0] sm:$0xff] }
  0x2f   :  { %284 = vmatpush.msrb.mxu2 %v878_v24  ;;  %306 = vmatpush.msrb.mxu3 %v866_v22  ;;  %v21_v22 = vld [vmem:[%s1527_s0 + $0x8] sm:$0xff]  ;;  %v1244_v24 = vld [vmem:[%s1529_s2 + $0x230] sm:$0xff] }
  0x30   :  { %227 = vmatpush.msrb.mxu0 %v1209_v14  ;;  %249 = vmatpush.msrb.mxu1 %v1214_v16 }
  0x31   :  { %285 = vmatpush.msrb.mxu2 %v902_v28  ;;  %307 = vmatpush.msrb.mxu3 %v890_v26  ;;  %v1257_v26 = vld [vmem:[%s1529_s2 + $0x228] sm:$0xff]  ;;  %v1262_v28 = vld [vmem:[%s1529_s2 + $0x2b0] sm:$0xff] }
  0x32   :  { %144 = vmatmul.f32.vlgmr.msra.gmra.mxu0 %v20_v18  ;;  %250 = vmatpush.msrb.mxu1 %v1226_v20  ;;  %v1281_v18 = vld [vmem:[%s1529_s2 + $0x2a8] sm:$0xff] }
  0x33   :  { %228 = vmatpush.msrb.mxu0 %v1233_v53  ;;  %286 = vmatpush.msrb.mxu2 %v926_v32  ;;  %v1274_v32 = vld [vmem:[%s1529_s2 + $0x220] sm:$0xff] }
  0x34   :  { %308 = vmatpush.msrb.mxu3 %v914_v30  ;;  %167 = vmatmul.f32.vlgmr.msra.gmra.mxu1 %v21_v22  ;;  %v22_v30 = vld [vmem:[%s1527_s0 + $0x10] sm:$0xff]  ;;  %v1295_v22 = vld [vmem:[%s1529_s2 + $0x218] sm:$0xff] }
  0x35   :  { %229 = vmatpush.msrb.mxu0 %v1244_v24  ;;  %251 = vmatpush.msrb.mxu1 %v1249_v47 }
  0x36   :  { %287 = vmatpush.msrb.mxu2 %v950_v36  ;;  %309 = vmatpush.msrb.mxu3 %v938_v34  ;;  %v26_v34 = vld [vmem:[%s1527_s0 + $0x30] sm:$0xff]  ;;  %v23_v36 = vld [vmem:[%s1527_s0 + $0x18] sm:$0xff] }
  0x37   :  { %230 = vmatpush.msrb.mxu0 %v1257_v26  ;;  %252 = vmatpush.msrb.mxu1 %v1262_v28 }
  0x38   :  { %288 = vmatpush.msrb.mxu2 %v974_v40  ;;  %310 = vmatpush.msrb.mxu3 %v962_v38  ;;  %v1302_v38 = vld [vmem:[%s1529_s2 + $0x2a0] sm:$0xff]  ;;  %v27_v40 = vld [vmem:[%s1527_s0 + $0x38] sm:$0xff] }
  0x39   :  { %190 = vmatmul.f32.vlgmr.msra.gmra.mxu2 %v22_v30  ;;  %231 = vmatpush.msrb.mxu0 %v1274_v32  ;;  %v1312_v30 = vld [vmem:[%s1529_s2 + $0x210] sm:$0xff] }
  0x3a   :  { %253 = vmatpush.msrb.mxu1 %v1281_v18  ;;  %289 = vmatpush.msrb.mxu2 %v998_v44  ;;  %v1317_v44 = vld [vmem:[%s1529_s2 + $0x298] sm:$0xff] }
  0x3b   :  { %311 = vmatpush.msrb.mxu3 %v986_v42  ;;  %147 = vmatmul.f32.gmra.mxu0 %v26_v34  ;;  %v1325_v42 = vld [vmem:[%s1529_s2 + $0x208] sm:$0xff]  ;;  %v1330_v34 = vld [vmem:[%s1529_s2 + $0x290] sm:$0xff] }
  0x3c   :  { %213 = vmatmul.f32.vlgmr.msra.gmra.mxu3 %v23_v36  ;;  %232 = vmatpush.msrb.mxu0 %v1295_v22  ;;  %v1349_v36 = vld [vmem:[%s1529_s2 + $0x288] sm:$0xff] }
  0x3d   :  { %254 = vmatpush.msrb.mxu1 %v1302_v38  ;;  %290 = vmatpush.msrb.mxu2 %v1022_v48  ;;  %v1342_v48 = vld [vmem:[%s1529_s2 + $0x200] sm:$0xff] }
  0x3e   :  { %312 = vmatpush.msrb.mxu3 %v1010_v46  ;;  %170 = vmatmul.f32.gmra.mxu1 %v27_v40  ;;  %v28_v46 = vld [vmem:[%s1527_s0 + $0x40] sm:$0xff]  ;;  %v462_v40 = vld [vmem:[%s1530_s3 + $0x30] sm:$0xff] }
  0x3f   :  { %233 = vmatpush.msrb.mxu0 %v1312_v30  ;;  %255 = vmatpush.msrb.mxu1 %v1317_v44 }
  0x40   :  { %291 = vmatpush.msrb.mxu2 %v1046_v52  ;;  %313 = vmatpush.msrb.mxu3 %v1034_v50  ;;  %v24_v50 = vld [vmem:[%s1527_s0 + $0x20] sm:$0xff]  ;;  %v29_v52 = vld [vmem:[%s1527_s0 + $0x48] sm:$0xff] }
  0x41   :  { %234 = vmatpush.msrb.mxu0 %v1325_v42  ;;  %256 = vmatpush.msrb.mxu1 %v1330_v34 }
  0x42   :  { %292 = vmatpush.msrb.mxu2 %v1070_v56  ;;  %314 = vmatpush.msrb.mxu3 %v1058_v54  ;;  %v1365_v56 = vld [vmem:[%s1529_s2 + $0x280] sm:$0xff]  ;;  %v25_v54 = vld [vmem:[%s1527_s0 + $0x28] sm:$0xff] }
  0x43   :  { %193 = vmatmul.f32.gmra.mxu2 %v28_v46  ;;  %235 = vmatpush.msrb.mxu0 %v1342_v48  ;;  %v460_v46 = vld [vmem:[%s1530_s3 + $0x20] sm:$0xff] }
  0x44   :  { %257 = vmatpush.msrb.mxu1 %v1349_v36  ;;  %293 = vmatpush.msrb.mxu2 %v1094_v60 }
  0x45   :  { %315 = vmatpush.msrb.mxu3 %v1082_v58  ;;  %236 = vmatmul.f32.vlgmr.msrb.gmra.mxu0 %v24_v50 }
  0x46   :  { %216 = vmatmul.f32.gmra.mxu3 %v29_v52  ;;  %324 = vmatpush.msra.mxu0 %v743_v1  ;;  %v30_v1 = vld [vmem:[%s1527_s0 + $0x50] sm:$0xff] }
  0x47   :  { %370 = vmatpush.msra.mxu2 %v1106_v62  ;;  %258 = vmatpush.msrb.mxu1 %v1365_v56 }
  0x48   :  { %316 = vmatpush.msrb.mxu3 %v1113_v63  ;;  %259 = vmatmul.f32.vlgmr.msrb.gmra.mxu1 %v25_v54 }
  0x49   :  { %325 = vmatpush.msra.mxu0 %v760_v4  ;;  %347 = vmatpush.msra.mxu1 %v765_v5  ;;  %v31_v4 = vld [vmem:[%s1527_s0 + $0x58] sm:$0xff]  ;;  %v266_v5 = vld [vmem:[%s1528_s1] sm:$0xff] }
  0x4a   :  { %371 = vmatpush.msra.mxu2 %v1125_v57  ;;  %393 = vmatpush.msra.mxu3 %v1130_v59 }
  0x4b   :  { %326 = vmatpush.msra.mxu0 %v782_v8  ;;  %348 = vmatpush.msra.mxu1 %v789_v9  ;;  %v267_v8 = vld [vmem:[%s1528_s1 + $0x8] sm:$0xff]  ;;  %v272_v9 = vld [vmem:[%s1528_s1 + $0x30] sm:$0xff] }
  0x4c   :  { %372 = vmatpush.msra.mxu2 %v1139_v61  ;;  %394 = vmatpush.msra.mxu3 %v1144_v51 }
  0x4d   :  { %327 = vmatpush.msra.mxu0 %v806_v12  ;;  %349 = vmatpush.msra.mxu1 %v811_v13  ;;  %v273_v12 = vld [vmem:[%s1528_s1 + $0x38] sm:$0xff]  ;;  %v1548_v13 = vld [vmem:[#allocation5_spill] sm:$0xff] }
  0x4e   :  { %373 = vmatpush.msra.mxu2 %v1153_v0  ;;  %395 = vmatpush.msra.mxu3 %v1158_v55  ;;  %v425_v55 = vld [vmem:[%s1530_s3] sm:$0xff] }
  0x4f   :  { %239 = vmatmul.f32.gmra.mxu0 %v30_v1  ;;  %350 = vmatpush.msra.mxu1 %v823_v15  ;;  %v1549_v15 = vld [vmem:[#allocation7_spill] sm:$0xff] }
  0x50   :  { %328 = vmatpush.msra.mxu0 %v835_v17  ;;  %374 = vmatpush.msra.mxu2 %v1167_v2  ;;  %v1550_v17 = vld [vmem:[#allocation6_spill] sm:$0xff] }
  0x51   :  { %396 = vmatpush.msra.mxu3 %v1172_v3  ;;  %262 = vmatmul.f32.gmra.mxu1 %v31_v4  ;;  %v665_v4 = vld [vmem:[%s1530_s3 + $0x48] ss:$0 sm:$0xff] }
  0x52   :  { %329 = vmatpush.msra.mxu0 %v859_v21  ;;  %351 = vmatpush.msra.mxu1 %v847_v19  ;;  %v1551_v19 = vld [vmem:[#allocation9_spill] sm:$0xff]  ;;  %v1552_v21 = vld [vmem:[#allocation8_spill] sm:$0xff] }
  0x53   :  { %375 = vmatpush.msra.mxu2 %v1181_v6  ;;  %397 = vmatpush.msra.mxu3 %v1186_v7  ;;  %v664_v6 = vld [vmem:[%s1530_s3 + $0x40] ss:$0 sm:$0xff] }
  0x54   :  { %330 = vmatpush.msra.mxu0 %v883_v25  ;;  %352 = vmatpush.msra.mxu1 %v871_v23  ;;  %v268_v23 = vld [vmem:[%s1528_s1 + $0x10] sm:$0xff]  ;;  %v270_v25 = vld [vmem:[%s1528_s1 + $0x20] sm:$0xff] }
  0x55   :  { %376 = vmatpush.msra.mxu2 %v1195_v10  ;;  %398 = vmatpush.msra.mxu3 %v1200_v11 }
  0x56   :  { %331 = vmatpush.msra.mxu0 %v907_v29  ;;  %353 = vmatpush.msra.mxu1 %v895_v27  ;;  %v1553_v27 = vld [vmem:[#allocation11_spill] sm:$0xff]  ;;  %v1554_v29 = vld [vmem:[#allocation10_spill] sm:$0xff] }
  0x57   :  { %377 = vmatpush.msra.mxu2 %v1209_v14  ;;  %399 = vmatpush.msra.mxu3 %v1214_v16 }
  0x58   :  { %294 = vmatmul.f32.vlgmr.msrb.gmra.mxu2 %v266_v5  ;;  %317 = vmatmul.f32.vlgmr.msrb.gmra.mxu3 %v267_v8 }
  0x59   :  { %332 = vmatpush.msra.mxu0 %v931_v33  ;;  %354 = vmatpush.msra.mxu1 %v919_v31  ;;  %v269_v31 = vld [vmem:[%s1528_s1 + $0x18] sm:$0xff]  ;;  %v271_v33 = vld [vmem:[%s1528_s1 + $0x28] sm:$0xff] }
  0x5a   :  { %378 = vmatpush.msra.mxu2 %v1233_v53  ;;  %400 = vmatpush.msra.mxu3 %v1226_v20  ;;  %v426_v53 = vld [vmem:[%s1530_s3 + $0x8] sm:$0xff] }
  0x5b   :  { %333 = vmatpush.msra.mxu0 %v955_v37  ;;  %355 = vmatpush.msra.mxu1 %v943_v35  ;;  %v1555_v35 = vld [vmem:[#allocation12_spill] sm:$0xff] }
  0x5c   :  { %379 = vmatpush.msra.mxu2 %v1244_v24  ;;  %401 = vmatpush.msra.mxu3 %v1249_v47  ;;  %v274_v37 = vld [vmem:[%s1528_s1 + $0x40] sm:$0xff]  ;;  %v427_v47 = vld [vmem:[%s1530_s3 + $0x10] sm:$0xff] }
  0x5d   :  { %334 = vmatpush.msra.mxu0 %v979_v41  ;;  %356 = vmatpush.msra.mxu1 %v967_v39  ;;  %v276_v39 = vld [vmem:[%s1528_s1 + $0x50] sm:$0xff]  ;;  %v275_v41 = vld [vmem:[%s1528_s1 + $0x48] sm:$0xff] }
  0x5e   :  { %380 = vmatpush.msra.mxu2 %v1257_v26  ;;  %402 = vmatpush.msra.mxu3 %v1262_v28 }
  0x5f   :  { %335 = vmatpush.msra.mxu0 %v1003_v45  ;;  %357 = vmatpush.msra.mxu1 %v991_v43  ;;  %v277_v43 = vld [vmem:[%s1528_s1 + $0x58] sm:$0xff] }
  0x60   :  { %381 = vmatpush.msra.mxu2 %v1274_v32  ;;  %403 = vmatpush.msra.mxu3 %v1281_v18  ;;  %v428_v45 = vld [vmem:[%s1530_s3 + $0x18] sm:$0xff] }
  0x61   :  { %297 = vmatmul.f32.gmra.mxu2 %v272_v9  ;;  %320 = vmatmul.f32.gmra.mxu3 %v273_v12 }
  0x62   :  { %336 = vmatpush.msra.mxu0 %v1027_v49  ;;  %358 = vmatpush.msra.mxu1 %v1548_v13 }
  0x63   :  { %382 = vmatpush.msra.mxu2 %v1295_v22  ;;  %404 = vmatpush.msra.mxu3 %v1302_v38 }
  0x64   :  { %337 = vmatpush.msra.mxu0 %v1549_v15  ;;  %359 = vmatpush.msra.mxu1 %v1550_v17 }
  0x65   :  { %383 = vmatpush.msra.mxu2 %v1312_v30  ;;  %405 = vmatpush.msra.mxu3 %v1317_v44  ;;  %v463_v30 = vld [vmem:[%s1530_s3 + $0x38] sm:$0xff] }
  0x66   :  { %338 = vmatpush.msra.mxu0 %v1551_v19  ;;  %360 = vmatpush.msra.mxu1 %v1552_v21  ;;  %v654_v44 = vpack.i.bf16 %v462_v40, %v463_v30 }
  0x67   :  { %384 = vmatpush.msra.mxu2 %v1325_v42  ;;  %406 = vmatpush.msra.mxu3 %v1330_v34 }
  0x68   :  { %339 = vmatpush.msra.mxu0 %v1553_v27  ;;  %361 = vmatpush.msra.mxu1 %v1554_v29 }
  0x69   :  { %385 = vmatpush.msra.mxu2 %v1342_v48  ;;  %407 = vmatpush.msra.mxu3 %v1349_v36  ;;  %v461_v48 = vld [vmem:[%s1530_s3 + $0x28] sm:$0xff]  ;;  %s709_s3 = smov [#allocation2]  }
  0x6a   :  { %340 = vmatmul.f32.vlgmr.msra.gmra.mxu0 %v268_v23  ;;  %386 = vmatmul.f32.vlgmr.msra.gmra.mxu2 %v270_v25  ;;  %v659_v36 = vpack.i.bf16 %v460_v46, %v461_v48  ;;  %s628_s11 = sshll.u32 %s709_s3, 4  ;;  %s629_s11 = int_to_ptr.vmem [resolvable:$true] %s628_s11 }
  0x6b   :  { %362 = vmatpush.msra.mxu1 %v1555_v35  ;;  %408 = vmatpush.msra.mxu3 %v1365_v56 }
  0x6c   :  { %363 = vmatmul.f32.vlgmr.msra.gmra.mxu1 %v269_v31  ;;  %409 = vmatmul.f32.vlgmr.msra.gmra.mxu3 %v271_v33 }
  0x6d   :  { %449 = vmatpush.msrb.mxu0 %v428_v45  ;;  %643 = vmatpush.msrb.mxu2 %v428_v45 }
  0x6e   :  { %655 = vrot.lane.b32.xlu0 %v654_v44, %s708_s30  ;;  %487 = vrot.lane.b32.xlu2 %v665_v4, %s708_s30 }
  0x6f   :  { %450 = vmatpush.msrb.mxu0 %v427_v47  ;;  %644 = vmatpush.msrb.mxu2 %v427_v47 }
  0x71   :  { %451 = vmatpush.msrb.mxu0 %v426_v53  ;;  %645 = vmatpush.msrb.mxu2 %v426_v53 }
  0x72   :  { %343 = vmatmul.f32.gmra.mxu0 %v274_v37  ;;  %389 = vmatmul.f32.gmra.mxu2 %v276_v39 }
  0x73   :  { %452 = vmatpush.msrb.mxu0 %v425_v55  ;;  %646 = vmatpush.msrb.mxu2 %v425_v55 }
  0x74   :  { %366 = vmatmul.f32.gmra.mxu1 %v275_v41  ;;  %412 = vmatmul.f32.gmra.mxu3 %v277_v43 }
  0x76   :  { %660 = vrot.lane.b32.xlu0 %v659_v36, %s708_s30 }
  0xaf   :  { %v145_v49 = vpop.f32.mrf.mxu0 }
  0xb1   :  { %v168_v51 = vpop.f32.mrf.mxu1 }
  0xb2   :  { %v169_v58 = vadd.f32 %v168_v51, %v145_v49 }
  0xb8   :  { %v148_v57 = vpop.f32.mrf.mxu0 }
  0xbb   :  { %v171_v59 = vpop.f32.mrf.mxu1 }
  0xbc   :  { %v191_v60 = vpop.f32.mrf.mxu2  ;;  %v172_v2 = vadd.f32 %v171_v59, %v148_v57 }
  0xbd   :  { %v192_v61 = vadd.f32 %v191_v60, %v169_v58 }
  0xbf   :  { %v214_v62 = vpop.f32.mrf.mxu3 }
  0xc0   :  { %v215_v63 = vadd.f32 %v214_v62, %v192_v61 }
  0xc2   :  { %v237_v0 = vpop.f32.mrf.mxu0 }
  0xc3   :  { %v238_v3 = vadd.f32 %v237_v0, %v215_v63 }
  0xc5   :  { %v260_v7 = vpop.f32.mrf.mxu1 }
  0xc6   :  { %v261_v10 = vadd.f32 %v260_v7, %v238_v3  ;;  %v194_v11 = vpop.f32.mrf.mxu2 }
  0xc7   :  { %v195_v14 = vadd.f32 %v194_v11, %v172_v2 }
  0xc8   :  { %v417_v16 = vadd.f32 %v664_v6, %v261_v10 }
  0xc9   :  { %v217_v20 = vpop.f32.mrf.mxu3 }
  0xca   :  { %666 = vtanh.f32 %v417_v16  ;;  %v218_v24 = vadd.f32 %v217_v20, %v195_v14 }
  0xcc   :  { %v240_v26 = vpop.f32.mrf.mxu0 }
  0xcd   :  { %v241_v28 = vadd.f32 %v240_v26, %v218_v24 }
  0xce   :  { %v263_v32 = vpop.f32.mrf.mxu1 }
  0xcf   :  { %v264_v18 = vadd.f32 %v263_v32, %v241_v28 }
  0xd0   :  { %v667_v22 = vpop.eup %666 }
  0xd1   :  { %v418_v38 = vadd.f32 %v664_v6, %v264_v18  ;;  %639 = vmatmul.msk.f32.vlgmr.msrb.gmra.mxu0 %vm430_vm0, %v667_v22 }
  0xd3   :  { %668 = vtanh.f32 %v418_v38 }
  0xd9   :  { %v669_v42 = vpop.eup %668 }
  0xda   :  { %640 = vmatmul.msk.f32.vlgmr.msrb.gmra.mxu2 %vm430_vm0, %v669_v42 }
  0xdb   :  { %v295_v34 = vpop.f32.mrf.mxu2  ;;  %v318_v50 = vpop.f32.mrf.mxu3 }
  0xdc   :  { %v319_v13 = vadd.f32 %v318_v50, %v295_v34 }
  0xe0   :  { %v656_v45 = vpop.permute.xlu0 %655 }
  0xe1   :  { %v658_v47 = vunpack.i.h.bf16 %v656_v45  ;;  %v657_v49 = vunpack.i.l.bf16 %v656_v45 }
  0xe3   :  { %506 = vmatpush.msrb.mxu1 %v657_v49  ;;  %647 = vmatpush.msrb.mxu3 %v657_v49 }
  0xe4   :  { %v298_v52 = vpop.f32.mrf.mxu2  ;;  %v321_v56 = vpop.f32.mrf.mxu3 }
  0xe5   :  { %v322_v8 = vadd.f32 %v321_v56, %v298_v52  ;;  %507 = vmatpush.msrb.mxu1 %v658_v47  ;;  %648 = vmatpush.msrb.mxu3 %v658_v47 }
  0xe7   :  { %v341_v54 = vpop.f32.mrf.mxu0 }
  0xe8   :  { %v342_v19 = vadd.f32 %v341_v54, %v319_v13  ;;  %v661_v55 = vpop.permute.xlu0 %660 }
  0xe9   :  { %v364_v1 = vpop.f32.mrf.mxu1  ;;  %v663_v58 = vunpack.i.h.bf16 %v661_v55  ;;  %v662_v59 = vunpack.i.l.bf16 %v661_v55 }
  0xea   :  { %v365_v25 = vadd.f32 %v364_v1, %v342_v19 }
  0xeb   :  { %649 = vmatpush.msrb.mxu3 %v662_v59  ;;  %508 = vmatpush.msrb.mxu1 %v662_v59 }
  0xed   :  { %v387_v5 = vpop.f32.mrf.mxu2  ;;  %650 = vmatpush.msrb.mxu3 %v663_v58  ;;  %509 = vmatpush.msrb.mxu1 %v663_v58 }
  0xee   :  { %v388_v31 = vadd.f32 %v387_v5, %v365_v25 }
  0xef   :  { %v344_v9 = vpop.f32.mrf.mxu0  ;;  %v410_v12 = vpop.f32.mrf.mxu3 }
  0xf0   :  { %v345_v15 = vadd.f32 %v344_v9, %v322_v8  ;;  %v411_v37 = vadd.f32 %v410_v12, %v388_v31 }
  0xf1   :  { %v367_v17 = vpop.f32.mrf.mxu1 }
  0xf2   :  { %v368_v21 = vadd.f32 %v367_v17, %v345_v15  ;;  %v421_v39 = vadd.f32 %v664_v6, %v411_v37 }
  0xf5   :  { %v390_v23 = vpop.f32.mrf.mxu2 }
  0xf6   :  { %v391_v27 = vadd.f32 %v390_v23, %v368_v21 }
  0xf7   :  { %v413_v29 = vpop.f32.mrf.mxu3 }
  0xf8   :  { %v414_v33 = vadd.f32 %v413_v29, %v391_v27 }
  0xfa   :  { %v422_v35 = vadd.f32 %v664_v6, %v414_v33  ;;  %v488_v6 = vpop.permute.xlu2 %487 }
  0xfc   :  { %670 = vtanh.f32 %v422_v35 }
  0xfd   :  { %672 = vtanh.f32 %v421_v39 }
 0x102   :  { %v671_v41 = vpop.eup %670 }
 0x103   :  { %468 = vrot.lane.b32.xlu1 %v671_v41, %s708_s30  ;;  %v673_v43 = vpop.eup %672 }
 0x10b   :  { %466 = vrot.lane.b32.xlu1 %v673_v43, %s708_s30 }
 0x14e   :  { %v454_v51 = vpop.f32.mrf.mxu0 }
 0x14f   :  { %v455_v53 = vadd.f32 %v665_v4, %v454_v51 }
 0x151   :  { %v525_v57 = vmul.f32 %v455_v53, %v455_v53 }
 0x153   :  { %v527_v60 = vsel %vm430_vm0, %v525_v57, 0.0 }
 0x154   :  { %528 = vadd.xlane.f32.xlu2 %v527_v60 }
 0x15d   :  { %v457_v61 = vpop.f32.mrf.mxu2 }
 0x15e   :  { %v458_v62 = vadd.f32 %v665_v4, %v457_v61 }
 0x160   :  { %v526_v63 = vmul.f32 %v458_v62, %v458_v62 }
 0x162   :  { %v530_v0 = vsel %vm430_vm0, %v526_v63, 0.0 }
 0x163   :  { %531 = vadd.xlane.f32.xlu1 %v530_v0 }
 0x175   :  { %v469_v2 = vpop.permute.xlu1 %468 }
 0x176   :  { %642 = vmatmul.msk.f32.vlgmr.msrb.gmra.mxu3 %vm430_vm0, %v469_v2 }
 0x17d   :  { %v467_v3 = vpop.permute.xlu1 %466 }
 0x17e   :  { %641 = vmatmul.msk.f32.vlgmr.msrb.gmra.mxu1 %vm430_vm0, %v467_v3 }
 0x1c7   :  { %v529_v38 = vpop.xlane.xlu2 %528 }
 0x1c8   :  { %v541_v40 = vmax.f32 %v529_v38, 1e-24 }
 0x1ca   :  { %674 = vrsqrt.f32 %v541_v40  ;;  %vm549_vm1 = vweird.f32 %v541_v40 }
 0x1d0   :  { %v675_v42 = vpop.eup %674 }
 0x1d1   :  { %v544_v34 = vmul.f32 %v675_v42, %v541_v40  ;;  %vm550_vm2 = vweird.f32 %v675_v42 }
 0x1d2   :  { %vm551_vm3 = vmor %vm549_vm1, %vm550_vm2 }
 0x1d3   :  { %v545_v50 = vmul.f32 %v675_v42, %v544_v34 }
 0x1d5   :  { %v546_v54 = vmul.f32 0.5, %v545_v50 }
 0x1d6   :  { %v532_v30 = vpop.xlane.xlu1 %531 }
 0x1d7   :  { %v542_v44 = vmax.f32 %v532_v30, 1e-24  ;;  %v547_v9 = vsub.f32 1.5, %v546_v54 }
 0x1d9   :  { %676 = vrsqrt.f32 %v542_v44  ;;  %v548_v19 = vmul.f32 %v675_v42, %v547_v9  ;;  %vm559_vm7 = vweird.f32 %v542_v44 }
 0x1db   :  { %v552_v31 = vsel %vm551_vm3, %v675_v42, %v548_v19 }
 0x1df   :  { %v677_v56 = vpop.eup %676 }
 0x1e0   :  { %v554_v1 = vmul.f32 %v677_v56, %v542_v44  ;;  %vm560_vm8 = vweird.f32 %v677_v56 }
 0x1e1   :  { %vm561_vm11 = vmor %vm559_vm7, %vm560_vm8 }
 0x1e2   :  { %v555_v12 = vmul.f32 %v677_v56, %v554_v1 }
 0x1e4   :  { %v556_v21 = vmul.f32 0.5, %v555_v12 }
 0x1e6   :  { %v557_v35 = vsub.f32 1.5, %v556_v21 }
 0x1e8   :  { %v558_v45 = vmul.f32 %v677_v56, %v557_v35 }
 0x1ea   :  { %v562_v51 = vsel %vm561_vm11, %v677_v56, %v558_v45 }
 0x1f9   :  { %v514_v7 = vpop.f32.mrf.mxu3 }
 0x1fa   :  { %v515_v10 = vadd.f32 %v514_v7, %v488_v6 }
 0x1fb   :  { %v511_v11 = vpop.f32.mrf.mxu1 }
 0x1fc   :  { %v512_v14 = vadd.f32 %v511_v11, %v488_v6  ;;  %v534_v16 = vmul.f32 %v515_v10, %v515_v10  ;;  %v518_v32 = vmul.f32 %v515_v10, %v458_v62 }
 0x1fe   :  { %v538_v20 = vsel %vm430_vm0, %v534_v16, 0.0  ;;  %v533_v24 = vmul.f32 %v512_v14, %v512_v14  ;;  %v517_v28 = vmul.f32 %v512_v14, %v455_v53  ;;  %v522_v22 = vsel %vm430_vm0, %v518_v32, 0.0 }
 0x1ff   :  { %539 = vadd.xlane.f32.xlu2 %v538_v20 }
 0x200   :  { %v535_v26 = vsel %vm430_vm0, %v533_v24, 0.0  ;;  %v519_v18 = vsel %vm430_vm0, %v517_v28, 0.0 }
 0x201   :  { %536 = vadd.xlane.f32.xlu0 %v535_v26 }
 0x207   :  { %520 = vadd.xlane.f32.xlu2 %v519_v18 }
 0x209   :  { %523 = vadd.xlane.f32.xlu0 %v522_v22 }
 0x272   :  { %v540_v46 = vpop.xlane.xlu2 %539 }
 0x273   :  { %v566_v48 = vmax.f32 %v540_v46, 1e-24 }
 0x274   :  { %v537_v36 = vpop.xlane.xlu0 %536 }
 0x275   :  { %678 = vrsqrt.f32 %v566_v48  ;;  %v565_v52 = vmax.f32 %v537_v36, 1e-24  ;;  %vm583_vm10 = vweird.f32 %v566_v48 }
 0x277   :  { %680 = vrsqrt.f32 %v565_v52  ;;  %vm573_vm5 = vweird.f32 %v565_v52 }
 0x27a   :  { %v521_v29 = vpop.xlane.xlu2 %520 }
 0x27b   :  { %v679_v4 = vpop.eup %678  ;;  %v563_v39 = vmul.f32 %v552_v31, %v521_v29 }
 0x27c   :  { %v578_v5 = vmul.f32 %v679_v4, %v566_v48  ;;  %vm584_vm9 = vweird.f32 %v679_v4  ;;  %v524_v49 = vpop.xlane.xlu0 %523 }
 0x27d   :  { %v681_v8 = vpop.eup %680  ;;  %vm585_vm12 = vmor %vm583_vm10, %vm584_vm9  ;;  %v564_v55 = vmul.f32 %v562_v51, %v524_v49 }
 0x27e   :  { %v579_v13 = vmul.f32 %v679_v4, %v578_v5  ;;  %v568_v15 = vmul.f32 %v681_v8, %v565_v52  ;;  %vm574_vm4 = vweird.f32 %v681_v8 }
 0x27f   :  { %vm575_vm6 = vmor %vm573_vm5, %vm574_vm4 }
 0x280   :  { %v569_v17 = vmul.f32 %v681_v8, %v568_v15  ;;  %v580_v23 = vmul.f32 0.5, %v579_v13 }
 0x282   :  { %v570_v25 = vmul.f32 0.5, %v569_v17  ;;  %v581_v33 = vsub.f32 1.5, %v580_v23 }
 0x284   :  { %v571_v27 = vsub.f32 1.5, %v570_v25  ;;  %v582_v47 = vmul.f32 %v679_v4, %v581_v33 }
 0x286   :  { %v572_v37 = vmul.f32 %v681_v8, %v571_v27  ;;  %v586_v53 = vsel %vm585_vm12, %v679_v4, %v582_v47 }
 0x287   :  { %v588_v57 = vmul.f32 %v586_v53, %v564_v55 }
 0x288   :  { %v576_v41 = vsel %vm575_vm6, %v681_v8, %v572_v37 }
 0x289   :  { %v587_v43 = vmul.f32 %v576_v41, %v563_v39 }
 0x28b   :  { %589 = vxpose.xlu1.b32.start [1/2] (short) (narrow) %v587_v43, 8 }
 0x293   :  { %590 = vxpose.xlu1.b32.end [2/2] (short) (narrow) %v588_v57, 8 }
 0x32f   :  { %v605_v58 = vpop.trf.xlu1 }
 0x330   :  { %622 = vst.msk [vmem:[#allocation2] sm:$0x1] %vm621_vm13, %v605_v58 }
 0x331   :  { %633 = dma.vmem_to_hbm [thread:$0]  %s629_s11, 16, %s631_s14, [#allocation3]  }
 0x332   :  { %706 = dma.done.wait [#allocation3], 16  }
 0x333   :  { %707 = vsyncadd [#allocation3], 4294967280 }
 0x334   :  { %638 = vsyncpa [#allocation3], 1 }

</bundles_post_ra>
